<compile_context>
chip_gen: v7x
topology: tpu7x:2x2x1
jax: 0.10.0
libtpu: 0.0.40
codegen_flags: <defaults>
</compile_context>

<pallas_src>
from functools import lru_cache, partial

import jax
import jax.numpy as jnp
from jax.experimental import pallas as pl
from jax.experimental.pallas import tpu as pltpu


def _patch_proj_kernel(p_ref, w_ref, b_ref, o_ref):
    # p_ref: (tm, Kp) compute dtype -- streamed patch-row tile
    # w_ref: (Kp, td) compute dtype -- resident weight, K on sublane / D on lane
    # b_ref: (1,  td) float32       -- resident bias
    # o_ref: (tm, td) output dtype
    acc = jnp.dot(p_ref[...], w_ref[...], preferred_element_type=jnp.float32)
    o_ref[...] = (acc + b_ref[...]).astype(o_ref.dtype)


def _round_up(x, m):
    return (x + m - 1) // m * m


@lru_cache(maxsize=1)
def _vmem_budget_bytes():
    """Usable per-kernel VMEM budget for this TPU generation (with headroom)."""
    phys = 64 << 20                       # conservative fallback (v7x physical)
    try:
        phys = int(pltpu.get_tpu_info().vmem_capacity_bytes)
    except Exception:
        pass
    # v5e/v6e (128 MiB) -> ~100 MiB usable; v7x (64 MiB) -> ~40 MiB usable.
    return int(min(max(phys - (24 << 20), 32 << 20), 100 << 20))


def _resident_spec(shape, index_map, single_buffer):
    if single_buffer:
        # Large resident slab: one VMEM copy is enough (it is grid-invariant
        # along the inner row axis), frees a full weight copy of VMEM.
        return pl.BlockSpec(shape, index_map, pipeline_mode=pl.Buffered(1))
    return pl.BlockSpec(shape, index_map)


@partial(jax.jit, static_argnames=("patch_size", "compute_dtype", "out_dtype"))
def patch_embedding(x, weight, bias, patch_size,
                    compute_dtype=jnp.bfloat16, out_dtype=None):
    """x: (B,C,H,W) NCHW; weight: (D,C,pH,pW); bias: (D,). Returns (B, N, D)."""
    B, C, H, W = x.shape
    pH, pW = patch_size
    assert H % pH == 0 and W % pW == 0
    Hp, Wp = H // pH, W // pW
    N = Hp * Wp
    D = weight.shape[0]
    K = C * pH * pW
    M = B * N
    out_dtype = x.dtype if out_dtype is None else out_dtype

    c_item = jnp.dtype(compute_dtype).itemsize
    o_item = jnp.dtype(out_dtype).itemsize

    # ---- aligned / padded problem sizes -----------------------------------
    Kp = _round_up(K, 128)                # contraction lanes
    Dp = _round_up(D, 128)                # output lanes -> lane-dense stores
    budget = _vmem_budget_bytes()

    # D-tile: only split the resident weight when it would blow the budget
    # (very large embed dims, mostly a v7x concern).
    td = Dp
    while (2 * Kp * td * c_item > int(0.35 * budget)
           and td > 128 and td % 256 == 0):
        td //= 2
    nj = Dp // td
    w_slab = Kp * td * c_item
    single_buf_w = w_slab >= (2 << 20)    # single-buffer big resident slabs
    w_bufs = 1 if single_buf_w else 2

    # Row tile: streamed patch tile ~2 MiB, multiple of 256 (full MXU tiles),
    # shrunk to fit the per-generation VMEM budget.  Small M -> single grid
    # step rounded to a multiple of 16 (bf16 sublane packing).
    tm = _round_up(max(1, (2 << 20) // max(1, Kp * c_item)), 256)
    tm = max(256, min(tm, 2048))

    def _need(tm_):
        return (2 * tm_ * Kp * c_item          # streamed patches (double-buffered)
                + w_bufs * (w_slab + 8 * td * 4)   # weight + bias
                + 2 * tm_ * td * o_item)           # output tile (double-buffered)

    while tm > 256 and _need(tm) + (4 << 20) > budget:
        tm -= 256
    if M <= tm:
        tm = max(16, _round_up(M, 16))
    Mp = _round_up(M, tm)
    nm = Mp // tm

    # ---- glue (one fused XLA producer): cast -> patchify -> pad -----------
    # Cast to the compute dtype BEFORE the transpose so the one unavoidable
    # activation re-layout moves half the bytes.
    xc = x.astype(compute_dtype)
    patches = xc.reshape(B, C, Hp, pH, Wp, pW)
    patches = jnp.transpose(patches, (0, 2, 4, 1, 3, 5)).reshape(M, K)
    if Mp != M or Kp != K:
        patches = jnp.pad(patches, ((0, Mp - M), (0, Kp - K)))

    # Conv weight (D,C,pH,pW) -> (K,D): one-time transpose so the kernel RHS is
    # canonical (K sublane, D lane) and feeds the MXU with no per-step vxpose.
    w2 = weight.reshape(D, K).T
    if Kp != K or Dp != D:
        w2 = jnp.pad(w2, ((0, Kp - K), (0, Dp - D)))
    w2 = w2.astype(compute_dtype)
    b2 = bias.astype(jnp.float32)
    if Dp != D:
        b2 = jnp.pad(b2, (0, Dp - D))
    b2 = b2.reshape(1, Dp)

    # Never clamp below the computed need (review correctness concern).
    vmem_need = _need(tm)
    vmem_limit = int(max(vmem_need + (4 << 20), 32 << 20))

    if nj == 1:
        grid = (nm,)
        in_specs = [
            pl.BlockSpec((tm, Kp), lambda m: (m, 0)),                   # streamed rows
            _resident_spec((Kp, td), lambda m: (0, 0), single_buf_w),   # weight
            _resident_spec((1, td), lambda m: (0, 0), single_buf_w),    # bias
        ]
        out_specs = pl.BlockSpec((tm, td), lambda m: (m, 0))
        dim_sem = ("parallel",)
    else:
        # j outer (weight tile resident across the inner row sweep), m inner.
        grid = (nj, nm)
        in_specs = [
            pl.BlockSpec((tm, Kp), lambda j, m: (m, 0)),
            _resident_spec((Kp, td), lambda j, m: (0, j), single_buf_w),
            _resident_spec((1, td), lambda j, m: (0, j), single_buf_w),
        ]
        out_specs = pl.BlockSpec((tm, td), lambda j, m: (m, j))
        dim_sem = ("parallel", "parallel")

    out = pl.pallas_call(
        _patch_proj_kernel,
        out_shape=jax.ShapeDtypeStruct((Mp, Dp), out_dtype),
        grid=grid,
        in_specs=in_specs,
        out_specs=out_specs,
        compiler_params=pltpu.CompilerParams(
            dimension_semantics=dim_sem,
            allow_input_fusion=[True, False, False],   # best-effort; not relied on
            vmem_limit_bytes=vmem_limit,
        ),
    )(patches, w2, b2)

    # Strip padding, restore (B, N, D).  norm_layer=None -> Identity (no op).
    return out[:M, :D].reshape(B, N, D)


def reference(x, weight, bias, patch_size, compute_dtype=None):
    """Pure-JAX reference mirroring nn.Conv2d(stride=kernel) + flatten/transpose."""
    if compute_dtype is not None:
        x = x.astype(compute_dtype)
        weight = weight.astype(compute_dtype)
    y = jax.lax.conv_general_dilated(
        x, weight, window_strides=patch_size, padding="VALID",
        dimension_numbers=("NCHW", "OIHW", "NCHW"),
        preferred_element_type=jnp.float32)
    y = y + bias.astype(jnp.float32).reshape(1, -1, 1, 1)
    B, D, Hp, Wp = y.shape
    return jnp.transpose(y.reshape(B, D, Hp * Wp), (0, 2, 1))


if __name__ == "__main__":
    key = jax.random.PRNGKey(0)
    patch = (8, 8)

    # Case 1: lane-aligned shapes (K = 4*8*8 = 256, D = 128), bf16 fast path.
    B, C, H, W, D = 2, 4, 32, 32, 128
    kx, kw, kb, kx2, kw2, kb2 = jax.random.split(key, 6)
    x = jax.random.normal(kx, (B, C, H, W), dtype=jnp.float32)
    w = jax.random.normal(kw, (D, C, patch[0], patch[1]), dtype=jnp.float32) * 0.02
    b = jax.random.normal(kb, (D,), dtype=jnp.float32) * 0.02

    out = jax.block_until_ready(patch_embedding(x, w, b, patch_size=patch))
    ref = jax.block_until_ready(reference(x, w, b, patch, compute_dtype=jnp.bfloat16))
    assert out.shape == (B, (H // patch[0]) * (W // patch[1]), D)
    assert jnp.allclose(out, ref.astype(out.dtype), atol=1e-2, rtol=1e-2)

    # Same shapes, bf16 output dtype (halves output HBM bytes; opt-in).
    out_b16 = jax.block_until_ready(
        patch_embedding(x, w, b, patch_size=patch, out_dtype=jnp.bfloat16))
    assert out_b16.dtype == jnp.bfloat16
    assert jnp.allclose(out_b16.astype(jnp.float32), ref, atol=3e-2, rtol=3e-2)

    # Same shapes with f32 compute: matches the exact f32 conv tightly.
    out32 = jax.block_until_ready(
        patch_embedding(x, w, b, patch_size=patch, compute_dtype=jnp.float32))
    ref32 = jax.block_until_ready(reference(x, w, b, patch))
    assert jnp.allclose(out32, ref32, atol=1e-4, rtol=1e-4)

    # Case 2: unaligned K (192 -> 256) and D (32 -> 128) exercise the padding path.
    B2, C2, H2, W2, D2 = 2, 3, 16, 16, 32
    x2 = jax.random.normal(kx2, (B2, C2, H2, W2), dtype=jnp.float32)
    w2 = jax.random.normal(kw2, (D2, C2, patch[0], patch[1]), dtype=jnp.float32) * 0.02
    b2 = jax.random.normal(kb2, (D2,), dtype=jnp.float32) * 0.02
    out2 = jax.block_until_ready(
        patch_embedding(x2, w2, b2, patch_size=patch, compute_dtype=jnp.float32))
    ref2 = jax.block_until_ready(reference(x2, w2, b2, patch))
    assert out2.shape == (B2, (H2 // patch[0]) * (W2 // patch[1]), D2)
    assert jnp.allclose(out2, ref2, atol=1e-4, rtol=1e-4)

    print("KERNEL_OK")
</pallas_src>

<mosaic_0001>
module attributes {stable_mosaic.version = 11 : i64} {
  func.func @_patch_proj_kernel(%arg0: i32, %arg1: memref<32x256xbf16, #tpu.memory_space<vmem>>, %arg2: memref<256x128xbf16, #tpu.memory_space<vmem>>, %arg3: memref<1x128xf32, #tpu.memory_space<vmem>>, %arg4: memref<32x128xf32, #tpu.memory_space<vmem>>) attributes {dimension_semantics = [#tpu.dimension_semantics<parallel>], iteration_bounds = array<i64: 1>, scalar_prefetch = 0 : i64, scratch_operands = 0 : i64, tpu.core_type = #tpu.core_type<tc>, window_params = [{transform_indices = @transform_0, window_bounds = array<i64: 32, 256>}, {pipeline_mode = #tpu.pipeline_mode<synchronous>, transform_indices = @transform_1, window_bounds = array<i64: 256, 128>}, {pipeline_mode = #tpu.pipeline_mode<synchronous>, transform_indices = @transform_2, window_bounds = array<i64: 1, 128>}, {transform_indices = @transform_3, window_bounds = array<i64: 32, 128>}]} {
    %c0 = arith.constant 0 : index
    %c0_0 = arith.constant 0 : index
    %0 = vector.load %arg1[%c0, %c0_0] : memref<32x256xbf16, #tpu.memory_space<vmem>>, vector<32x256xbf16>
    %c0_1 = arith.constant 0 : index
    %c0_2 = arith.constant 0 : index
    %1 = vector.load %arg2[%c0_1, %c0_2] : memref<256x128xbf16, #tpu.memory_space<vmem>>, vector<256x128xbf16>
    %cst = arith.constant dense<0.000000e+00> : vector<32x128xf32>
    %2 = tpu.matmul %0, %1, %cst {dimension_numbers = #tpu.dot_dimension_numbers<[1], [0], [0], [1], [0, 0, 1, 1], [], []>} : vector<32x256xbf16>, vector<256x128xbf16>, vector<32x128xf32> -> vector<32x128xf32>
    %c0_3 = arith.constant 0 : index
    %c0_4 = arith.constant 0 : index
    %3 = vector.load %arg3[%c0_3, %c0_4] : memref<1x128xf32, #tpu.memory_space<vmem>>, vector<1x128xf32>
    %4 = vector.broadcast %3 : vector<1x128xf32> to vector<32x128xf32>
    %5 = arith.addf %2, %4 : vector<32x128xf32>
    %c0_5 = arith.constant 0 : index
    %c0_6 = arith.constant 0 : index
    %6 = vector.load %arg4[%c0_5, %c0_6] : memref<32x128xf32, #tpu.memory_space<vmem>>, vector<32x128xf32>
    tpu.vector_store %arg4[%c0_5, %c0_6], %5 {strides = array<i32>} : memref<32x128xf32, #tpu.memory_space<vmem>>, vector<32x128xf32>,
    return
  }
  func.func @transform_0(%arg0: i32) -> (i32, i32) {
    %c0_i32 = arith.constant 0 : i32
    %c0_i32_0 = arith.constant 0 : i32
    return %arg0, %c0_i32 : i32, i32
  }
  func.func @transform_1(%arg0: i32) -> (i32, i32) {
    %c0_i32 = arith.constant 0 : i32
    %c0_i32_0 = arith.constant 0 : i32
    %c0_i32_1 = arith.constant 0 : i32
    return %c0_i32, %c0_i32_0 : i32, i32
  }
  func.func @transform_2(%arg0: i32) -> (i32, i32) {
    %c0_i32 = arith.constant 0 : i32
    %c0_i32_0 = arith.constant 0 : i32
    %c0_i32_1 = arith.constant 0 : i32
    return %c0_i32, %c0_i32_0 : i32, i32
  }
  func.func @transform_3(%arg0: i32) -> (i32, i32) {
    %c0_i32 = arith.constant 0 : i32
    %c0_i32_0 = arith.constant 0 : i32
    return %arg0, %c0_i32 : i32, i32
  }
}

</mosaic_0001>

<bundles_post_ra>
// kernel: patch_embedding.1
= control target key start
LH: loop header
LB: loop body
LE: loop exit
PB: predicated region body
PF: predicated region fallthrough
CT: control target
= control target key end

     0   :  { %s456_s0 = inlined_call_operand.vmem [shape: bf16[32,256], index: 0, kind: input, shape index: {}]   ;;  %s457_s1 = inlined_call_operand.vmem [shape: bf16[256,128], index: 1, kind: input, shape index: {}]   ;;  %s458_s2 = inlined_call_operand.vmem [shape: f32[1,128], index: 2, kind: input, shape index: {}]   ;;  %s459_s3 = inlined_call_operand.hbm [shape: f32[32,128], index: 3, kind: output, shape index: {}]  }
   0x1   :  { %v312_v0 = vld [vmem:[%s457_s1 + $0x40] sm:$0xff]   ;;  %v314_v2 = vld [vmem:[%s457_s1 + $0x48] sm:$0xff]   ;;  %v316_v4 = vld [vmem:[%s457_s1 + $0x50] sm:$0xff]  }
   0x2   :  { %v313_v1 = vld [vmem:[%s457_s1] sm:$0xff]   ;;  %265 = vmatprep.subr.bf16.mxu0 %v312_v0  ;;  %293 = vmatprep.subr.bf16.mxu1 %v312_v0  ;;  %v315_v3 = vld [vmem:[%s457_s1 + $0x8] sm:$0xff]   ;;  %v317_v5 = vld [vmem:[%s457_s1 + $0x10] sm:$0xff]  }
   0x3   :  { %266 = vmatpush3.bf16.msra.mxu0 %v313_v1  ;;  %301 = vmatpush3.bf16.msra.mxu1 %v313_v1  ;;  %v318_v6 = vld [vmem:[%s457_s1 + $0x58] sm:$0xff]   ;;  %v320_v8 = vld [vmem:[%s457_s1 + $0x60] sm:$0xff]   ;;  %v322_v10 = vld [vmem:[%s457_s1 + $0x68] sm:$0xff]  }
   0x4   :  { %267 = vmatprep.subr.bf16.mxu0 %v314_v2  ;;  %294 = vmatprep.subr.bf16.mxu1 %v314_v2  ;;  %v319_v7 = vld [vmem:[%s457_s1 + $0x18] sm:$0xff]   ;;  %v321_v9 = vld [vmem:[%s457_s1 + $0x20] sm:$0xff]  }
   0x5   :  { %v330_v11 = vld [vmem:[%s456_s0 + $0x4] ss:$8 sps:$4 sm:$0xff]   ;;  %v333_v12 = vld [vmem:[%s456_s0 + $0x14] ss:$8 sps:$4 sm:$0xff]  }
   0x7   :  { %268 = vmatpush3.bf16.msra.mxu0 %v315_v3  ;;  %302 = vmatpush3.bf16.msra.mxu1 %v315_v3 }
   0x8   :  { %269 = vmatprep.subr.bf16.mxu0 %v316_v4  ;;  %295 = vmatprep.subr.bf16.mxu1 %v316_v4 }
   0xb   :  { %270 = vmatpush3.bf16.msra.mxu0 %v317_v5  ;;  %303 = vmatpush3.bf16.msra.mxu1 %v317_v5 }
   0xc   :  { %271 = vmatprep.subr.bf16.mxu0 %v318_v6  ;;  %296 = vmatprep.subr.bf16.mxu1 %v318_v6 }
   0xf   :  { %272 = vmatpush3.bf16.msra.mxu0 %v319_v7  ;;  %304 = vmatpush3.bf16.msra.mxu1 %v319_v7 }
  0x10   :  { %273 = vmatprep.subr.bf16.mxu0 %v320_v8  ;;  %297 = vmatprep.subr.bf16.mxu1 %v320_v8 }
  0x11   :  { %8 = vsyncpa [#allocation3], 0  ;;  %v323_v13 = vld [vmem:[%s457_s1 + $0x28] sm:$0xff]   ;;  %v324_v14 = vld [vmem:[%s457_s1 + $0x70] sm:$0xff]   ;;  %207 = vmatprep.mubr.bf16.mxu0 %v330_v11  ;;  %215 = vmatprep.mubr.bf16.mxu1 %v333_v12 }
  0x12   :  { %v325_v15 = vld [vmem:[%s457_s1 + $0x30] sm:$0xff]   ;;  %v326_v16 = vld [vmem:[%s457_s1 + $0x78] sm:$0xff]   ;;  %v328_v18 = vld [vmem:[%s456_s0] ss:$8 sps:$4 sm:$0xff]  }
  0x13   :  { %274 = vmatpush3.bf16.msra.mxu0 %v321_v9  ;;  %305 = vmatpush3.bf16.msra.mxu1 %v321_v9  ;;  %v327_v17 = vld [vmem:[%s457_s1 + $0x38] sm:$0xff]   ;;  %v244_v22 = vld [vmem:[%s458_s2] ss:$0 sm:$0xff]  ;;  %s358_s1 = smov [#allocation2]  }
  0x14   :  { %275 = vmatprep.subr.bf16.mxu0 %v322_v10  ;;  %298 = vmatprep.subr.bf16.mxu1 %v322_v10  ;;  %v331_v19 = vld [vmem:[%s456_s0 + $0x10] ss:$8 sps:$4 sm:$0xff]   ;;  %s233_s27 = sshll.u32 %s358_s1, 4  ;;  %s234_s27 = int_to_ptr.vmem [resolvable:$true] %s233_s27 }
  0x15   :  { %s334_s0 = scalar_lea.vmem %s234_s27, 512  ;;  %p339_p1 = scmp.lt.s32.totalorder %s234_s27, %s234_s27 }
  0x16   :  { %p335_p0 = scmp.ne.s32.totalorder %s234_s27, %s334_s0  ;;  %p340_p2 = scmp.lt.s32.totalorder %s334_s0, %s334_s0 }
  0x17   :  { %276 = vmatpush3.bf16.msra.mxu0 %v323_v13  ;;  %306 = vmatpush3.bf16.msra.mxu1 %v323_v13 }
  0x18   :  { %277 = vmatprep.subr.bf16.mxu0 %v324_v14  ;;  %299 = vmatprep.subr.bf16.mxu1 %v324_v14  ;;  %p341_p3 = por %p340_p2, %p339_p1 }
  0x1a   :  { %p342_p4 = pnand %p341_p3, %p335_p0 }
  0x1b   :  { %278 = vmatpush3.bf16.msra.mxu0 %v325_v15  ;;  %307 = vmatpush3.bf16.msra.mxu1 %v325_v15 }
  0x1c   :  { %279 = vmatprep.subr.bf16.mxu0 %v326_v16  ;;  %300 = vmatprep.subr.bf16.mxu1 %v326_v16 }
  0x1f   :  { %280 = vmatpush3.bf16.msra.mxu0 %v327_v17  ;;  %308 = vmatpush3.bf16.msra.mxu1 %v327_v17 }
  0x22   :  { %208 = vmatmul.mubr.bf16.vlgmr.msra.gmra.mrb[0].mxu0 %v328_v18  ;;  %216 = vmatmul.mubr.bf16.vlgmr.msra.gmra.mrb[0].mxu1 %v331_v19 }
  0xf5   :  { %v281_v20 = vpop.f32.mrb[0].mxu0  ;;  %v287_v21 = vpop.f32.mrb[0].mxu1 }
  0xf6   :  { %v282_v23 = vpop.f32.mrb[1].mxu0  ;;  %v288_v24 = vpop.f32.mrb[1].mxu1 }
  0xf7   :  { %v283_v25 = vadd.f32 %v282_v23, %v281_v20  ;;  %v289_v26 = vadd.f32 %v288_v24, %v287_v21  ;;  %v284_v27 = vpop.f32.mrb[2].mxu0  ;;  %v290_v28 = vpop.f32.mrb[2].mxu1 }
  0xf8   :  { %v285_v29 = vpop.f32.mrb[3].mxu0  ;;  %v291_v30 = vpop.f32.mrb[3].mxu1 }
  0xf9   :  { %v210_v31 = vadd.f32 %v283_v25, %v244_v22  ;;  %v218_v32 = vadd.f32 %v289_v26, %v244_v22  ;;  %v286_v33 = vadd.f32 %v285_v29, %v284_v27  ;;  %v292_v34 = vadd.f32 %v291_v30, %v290_v28 }
  0xfb   :  { %224 = vst [vmem:[#allocation2] sm:$0xff] %v210_v31  ;;  %226 = vst [vmem:[#allocation2 + $0x10] sm:$0xff] %v218_v32  ;;  %v213_v35 = vadd.f32 %v286_v33, %v244_v22  ;;  %v221_v36 = vadd.f32 %v292_v34, %v244_v22 }
  0xfd   :  { %225 = vst [vmem:[#allocation2 + $0x8] sm:$0xff] %v213_v35  ;;  %227 = vst [vmem:[#allocation2 + $0x18] sm:$0xff] %v221_v36 }
  0xfe   :  { %345 = shalt.err (!%p342_p4)
}
  0xff   :  { %s346_s29 = scalar_lea.hbm %s459_s3, 512 }
 0x100   :  { %p347_p5 = scmp.ne.s32.totalorder %s459_s3, %s346_s29  ;;  %p350_p6 = scmp.lt.u32.totalorder %s346_s29, %s459_s3 }
 0x102   :  { %p352_p7 = pnand %p350_p6, %p347_p5 }
 0x104   :  { %355 = shalt.err (!%p352_p7)
}
 0x105   :  { %s359_s7 = smov 128   ;;  %s360_s8 = smov 8  }
 0x106   :  { %239 = dma.vmem_to_hbm [thread:$0]  %s234_s27, 512, %s459_s3, [#allocation3], %s359_s7, %s359_s7, %s360_s8  }
 0x107   :  { %356 = dma.done.wait [#allocation3], 512  }
 0x108   :  { %357 = vsyncadd [#allocation3], 4294966784 }
 0x109   :  { %243 = vsyncpa [#allocation3], 1 }

</bundles_post_ra>
